<compile_context>
chip_gen: v7x
topology: tpu7x:2x2x1
jax: 0.10.0
libtpu: 0.0.40
codegen_flags: <defaults>
</compile_context>

<pallas_src>
import functools

import jax
import jax.numpy as jnp
from jax.experimental import pallas as pl
from jax.experimental.pallas import tpu as pltpu

_LANES = 128
_SUBLANES = 8


def logreg_kernel(x_ref, wt_ref, b_ref, o_ref):
    # x_ref: (TB, D) bf16, wt_ref: (D, Y_pad) bf16 (resident), b_ref: (1, Y_pad) f32 (resident)
    # o_ref: (TB, Y_pad) f32
    z = jnp.dot(x_ref[...], wt_ref[...], preferred_element_type=jnp.float32) + b_ref[...]
    # sigmoid(z) == 0.5 * (1 + tanh(0.5 * z))  -- single EUP transcendental
    o_ref[...] = (0.5 * (1.0 + jnp.tanh(0.5 * z))).astype(o_ref.dtype)


@functools.partial(jax.jit, static_argnames=("block_b",))
def logistic_regression(x, weight, bias, *, block_b=512):
    """x: (B, D) f32, weight: (Y, D) f32 (nn.Linear layout), bias: (Y,) f32 -> (B, Y) f32."""
    B, D = x.shape
    Y, _ = weight.shape
    compute_dtype = jnp.bfloat16  # f32 accumulation via preferred_element_type in the kernel

    # --- wrapper-side layout prep (amortized; weights are static across calls) ---
    y_pad = max(_LANES, pl.cdiv(Y, _LANES) * _LANES)          # lane-dense output width
    w_t = jnp.zeros((D, y_pad), compute_dtype).at[:, :Y].set(
        weight.T.astype(compute_dtype))                        # (D, Y_pad), MXU-native RHS
    b2 = jnp.zeros((1, y_pad), jnp.float32).at[:, :Y].set(bias.astype(jnp.float32))

    # Batch tile: big enough to hit HBM roofline, small enough for v7x's 64 MiB VMEM.
    tb = block_b if B >= block_b else max(_SUBLANES, pl.cdiv(B, _SUBLANES) * _SUBLANES)
    b_pad = pl.cdiv(B, tb) * tb
    x_p = x.astype(compute_dtype)
    if b_pad != B:
        x_p = jnp.zeros((b_pad, D), compute_dtype).at[:B, :].set(x_p)

    grid = (b_pad // tb,)

    cost = pl.CostEstimate(
        flops=2 * b_pad * D * y_pad,
        transcendentals=b_pad * y_pad,
        bytes_accessed=(x_p.size * x_p.dtype.itemsize
                        + w_t.size * w_t.dtype.itemsize
                        + b2.size * b2.dtype.itemsize
                        + b_pad * y_pad * 4),
    )

    out = pl.pallas_call(
        logreg_kernel,
        out_shape=jax.ShapeDtypeStruct((b_pad, y_pad), jnp.float32),
        grid=grid,
        in_specs=[
            pl.BlockSpec((tb, D), lambda i: (i, 0)),       # x: streamed per batch tile
            pl.BlockSpec((D, y_pad), lambda i: (0, 0)),    # W^T: resident across the grid
            pl.BlockSpec((1, y_pad), lambda i: (0, 0)),    # bias: resident across the grid
        ],
        out_specs=pl.BlockSpec((tb, y_pad), lambda i: (i, 0)),
        compiler_params=pltpu.CompilerParams(
            dimension_semantics=("parallel",),             # shard batch tiles across TCs (v7x)
            vmem_limit_bytes=32 * 1024 * 1024,
        ),
        cost_estimate=cost,
    )(x_p, w_t, b2)

    # TODO(synk): if D grows to the tens of thousands, add a K grid axis with an f32
    # accumulator scratch (pl.when init/finalize) to bound the resident W^T tile.
    return out[:B, :Y]


if __name__ == "__main__":
    key = jax.random.PRNGKey(0)
    kw, kb = jax.random.split(key, 2)

    batch, x_dim, y_dim = 2, 3, 1

    # Example input mirroring the demo: [[1,2,3],[4,5,6]]
    x = jnp.array([[1.0, 2.0, 3.0], [4.0, 5.0, 6.0]], dtype=jnp.float32)

    # Deterministic parameter init (nn.Linear-style uniform(-1/sqrt(D), 1/sqrt(D)))
    bound = 1.0 / jnp.sqrt(jnp.float32(x_dim))
    weight = jax.random.uniform(kw, (y_dim, x_dim), jnp.float32, -bound, bound)
    bias = jax.random.uniform(kb, (y_dim,), jnp.float32, -bound, bound)

    y = logistic_regression(x, weight, bias)
    jax.block_until_ready(y)

    # Cross-check against pure-JAX f32 reference (bf16 inputs -> loosened tolerance)
    y_ref = jax.nn.sigmoid(x @ weight.T + bias)
    assert y.shape == (batch, y_dim), y.shape
    assert jnp.allclose(y, y_ref, atol=2e-2), (y, y_ref)

    print("KERNEL_OK")
</pallas_src>

<mosaic_0001>
module attributes {stable_mosaic.version = 11 : i64} {
  func.func @logreg_kernel(%arg0: i32, %arg1: memref<8x3xbf16, #tpu.memory_space<vmem>>, %arg2: memref<3x128xbf16, #tpu.memory_space<vmem>>, %arg3: memref<1x128xf32, #tpu.memory_space<vmem>>, %arg4: memref<8x128xf32, #tpu.memory_space<vmem>>) attributes {dimension_semantics = [#tpu.dimension_semantics<parallel>], iteration_bounds = array<i64: 1>, scalar_prefetch = 0 : i64, scratch_operands = 0 : i64, tpu.core_type = #tpu.core_type<tc>, window_params = [{transform_indices = @transform_0, window_bounds = array<i64: 8, 3>}, {pipeline_mode = #tpu.pipeline_mode<synchronous>, transform_indices = @transform_1, window_bounds = array<i64: 3, 128>}, {pipeline_mode = #tpu.pipeline_mode<synchronous>, transform_indices = @transform_2, window_bounds = array<i64: 1, 128>}, {transform_indices = @transform_3, window_bounds = array<i64: 8, 128>}]} {
    %c0 = arith.constant 0 : index
    %c0_0 = arith.constant 0 : index
    %0 = vector.load %arg1[%c0, %c0_0] : memref<8x3xbf16, #tpu.memory_space<vmem>>, vector<8x3xbf16>
    %c0_1 = arith.constant 0 : index
    %c0_2 = arith.constant 0 : index
    %1 = vector.load %arg2[%c0_1, %c0_2] : memref<3x128xbf16, #tpu.memory_space<vmem>>, vector<3x128xbf16>
    %cst = arith.constant dense<0.000000e+00> : vector<8x128xf32>
    %2 = tpu.matmul %0, %1, %cst {dimension_numbers = #tpu.dot_dimension_numbers<[1], [0], [0], [1], [0, 0, 1, 1], [], []>} : vector<8x3xbf16>, vector<3x128xbf16>, vector<8x128xf32> -> vector<8x128xf32>
    %c0_3 = arith.constant 0 : index
    %c0_4 = arith.constant 0 : index
    %3 = vector.load %arg3[%c0_3, %c0_4] : memref<1x128xf32, #tpu.memory_space<vmem>>, vector<1x128xf32>
    %4 = vector.broadcast %3 : vector<1x128xf32> to vector<8x128xf32>
    %5 = arith.addf %2, %4 : vector<8x128xf32>
    %cst_5 = arith.constant 5.000000e-01 : f32
    %6 = vector.broadcast %cst_5 : f32 to vector<8x128xf32>
    %7 = arith.mulf %6, %5 : vector<8x128xf32>
    %8 = math.tanh %7 : vector<8x128xf32>
    %cst_6 = arith.constant 1.000000e+00 : f32
    %9 = vector.broadcast %cst_6 : f32 to vector<8x128xf32>
    %10 = arith.addf %9, %8 : vector<8x128xf32>
    %cst_7 = arith.constant 5.000000e-01 : f32
    %11 = vector.broadcast %cst_7 : f32 to vector<8x128xf32>
    %12 = arith.mulf %11, %10 : vector<8x128xf32>
    %c0_8 = arith.constant 0 : index
    %c0_9 = arith.constant 0 : index
    %13 = vector.load %arg4[%c0_8, %c0_9] : memref<8x128xf32, #tpu.memory_space<vmem>>, vector<8x128xf32>
    tpu.vector_store %arg4[%c0_8, %c0_9], %12 {strides = array<i32>} : memref<8x128xf32, #tpu.memory_space<vmem>>, vector<8x128xf32>,
    return
  }
  func.func @transform_0(%arg0: i32) -> (i32, i32) {
    %c0_i32 = arith.constant 0 : i32
    %c0_i32_0 = arith.constant 0 : i32
    return %arg0, %c0_i32 : i32, i32
  }
  func.func @transform_1(%arg0: i32) -> (i32, i32) {
    %c0_i32 = arith.constant 0 : i32
    %c0_i32_0 = arith.constant 0 : i32
    %c0_i32_1 = arith.constant 0 : i32
    return %c0_i32, %c0_i32_0 : i32, i32
  }
  func.func @transform_2(%arg0: i32) -> (i32, i32) {
    %c0_i32 = arith.constant 0 : i32
    %c0_i32_0 = arith.constant 0 : i32
    %c0_i32_1 = arith.constant 0 : i32
    return %c0_i32, %c0_i32_0 : i32, i32
  }
  func.func @transform_3(%arg0: i32) -> (i32, i32) {
    %c0_i32 = arith.constant 0 : i32
    %c0_i32_0 = arith.constant 0 : i32
    return %arg0, %c0_i32 : i32, i32
  }
}

</mosaic_0001>

<bundles_post_ra>
// kernel: logistic_regression.1
= control target key start
LH: loop header
LB: loop body
LE: loop exit
PB: predicated region body
PF: predicated region fallthrough
CT: control target
= control target key end

     0   :  { %vm28_vm0 = vcmask 1040384   ;;  %vm29_vm1 = vcmask 1041408   ;;  %v99_v0 = vmov 0.0   ;;  %v100_v2 = vmov 65535   ;;  %s134_s1 = inlined_call_operand.vmem [shape: bf16[3,128], index: 1, kind: input, shape index: {}]   ;;  %s135_s0 = inlined_call_operand.vmem [shape: bf16[8,3], index: 0, kind: input, shape index: {}]   ;;  %s136_s2 = inlined_call_operand.vmem [shape: f32[1,128], index: 2, kind: input, shape index: {}]   ;;  %s137_s3 = inlined_call_operand.vmem [shape: f32[8,128], index: 3, kind: output, shape index: {}]  }
   0x1   :  { %88 = vmatprep.subr.bf16.mxu0 %v99_v0  ;;  %v16_v1 = vld [vmem:[%s134_s1] sm:$0x3]  ;;  %v30_v3 = vsel %vm28_vm0, 4294967295, %v100_v2  ;;  %vm101_vm2 = vmmov 0   ;;  %vm24_vm3 = vcmask 23552  }
   0x2   :  { %v31_v4 = vsel %vm29_vm1, %v30_v3, 0  ;;  %90 = vmatprep.mubr.msk.bf16.mxu0 %vm101_vm2, %v99_v0  ;;  %v15_v6 = vld [vmem:[%s135_s0] sm:$0xf] }
   0x3   :  { %v33_v5 = vand.u32 %v31_v4, %v16_v1  ;;  %v84_v7 = vld [vmem:[%s136_s2] ss:$0 sm:$0xff] }
   0x5   :  { %89 = vmatpush3.bf16.msra.mxu0 %v33_v5 }
   0x8   :  { %91 = vmatmul.mubr.msk.bf16.vlgmr.msra.gmra.mrb[0].mxu0 %vm24_vm3, %v15_v6 }
  0xdb   :  { %v69_v8 = vpop.f32.mrb[0].mxu0 }
  0xdc   :  { %v70_v9 = vadd.f32 %v84_v7, %v69_v8  ;;  %v92_v10 = vpop.f32.mrb[1].mxu0 }
  0xdd   :  { %v72_v11 = vpop.f32.mrb[2].mxu0 }
  0xde   :  { %v75_v12 = vmul.f32 0.5, %v70_v9  ;;  %v93_v13 = vpop.f32.mrb[3].mxu0 }
  0xe0   :  { %97 = vtanh.f32 %v75_v12 }
  0xea   :  { %v98_v14 = vpop.eup %97 }
  0xeb   :  { %v77_v15 = vadd.f32 1.0, %v98_v14 }
  0xed   :  { %v78_v16 = vmul.f32 0.5, %v77_v15 }
  0xef   :  { %79 = vst [vmem:[%s137_s3] sm:$0xff] %v78_v16 }

</bundles_post_ra>
